<compile_context>
chip_gen: v7x
topology: tpu7x:2x2x1
jax: 0.10.0
libtpu: 0.0.40
codegen_flags: <defaults>
</compile_context>

<pallas_src>
import numpy as np
import jax
import jax.numpy as jnp
from jax import lax
from jax.experimental import pallas as pl
from jax.experimental.pallas import tpu as pltpu

LN_EPS = 1e-5


def _gating_kernel(gate_ref, res_ref, w_ref, b_ref, gamma_ref, beta_ref, o_ref):
    """One (H, TB, dh, S) batch-tile per grid step.

    gate_ref, res_ref, o_ref : (H, TB, dh, S)  activations (f32 in, x.dtype out)
    w_ref                    : (H, S, S)       bf16 seq-mixing weights (constant block)
    b_ref                    : (H, 1, S)       f32 per-head bias slab
    gamma_ref, beta_ref      : (H, 1, dh, 1)   f32 LayerNorm affine params
    """
    H, TB, dh, S = gate_ref.shape
    feat = jnp.float32(H * dh)

    gate = gate_ref[...]                                    # (H, TB, dh, S) f32
    # LayerNorm over the dim_half = H*dh feature axes, per (batch, seq) column.
    s1 = jnp.sum(gate, axis=0, keepdims=True)               # (1, TB, dh, S)
    mean = jnp.sum(s1, axis=2, keepdims=True) / feat        # (1, TB, 1, S)
    diff = gate - mean
    v1 = jnp.sum(diff * diff, axis=0, keepdims=True)
    var = jnp.sum(v1, axis=2, keepdims=True) / feat         # (1, TB, 1, S)
    g_n = diff * lax.rsqrt(var + LN_EPS)
    g_n = g_n * gamma_ref[...] + beta_ref[...]              # (H, TB, dh, S)

    # Batched-over-heads seq mixing on the MXU:
    #   out[h, m, s] = sum_t g_n[h, m, t] * w[h, s, t]   (m folds batch & dh)
    lhs = g_n.reshape(H, TB * dh, S).astype(jnp.bfloat16)
    gated = lax.dot_general(
        lhs, w_ref[...],
        dimension_numbers=(((2,), (2,)), ((0,), (0,))),
        preferred_element_type=jnp.float32)                  # (H, TB*dh, S)
    gated = gated + b_ref[...]                               # bias over (h, s), once
    gated = gated.reshape(H, TB, dh, S)
    # Single lane-dense (S on lanes) store of the full tile.
    o_ref[...] = (gated * res_ref[...]).astype(o_ref.dtype)


def _pick_block_b(B, max_tb=8):
    """Largest batch-tile that divides B, preferring >=2 grid steps (megacore)."""
    cands = [tb for tb in range(1, min(B, max_tb) + 1) if B % tb == 0]
    two_plus = [tb for tb in cands if B // tb >= 2]
    return max(two_plus) if two_plus else max(cands)


def _padded_bytes(shape, dtype):
    """Conservative VMEM footprint of one block ((8,128)-padded last two dims)."""
    s = list(shape)
    if len(s) >= 1:
        s[-1] = -(-s[-1] // 128) * 128
    if len(s) >= 2:
        s[-2] = -(-s[-2] // 8) * 8
    n = 1
    for d in s:
        n *= d
    return n * np.dtype(dtype).itemsize


def gating_unit(x, weights, biases, ln_gamma, ln_beta, block_b=None):
    """Pallas wrapper.

    x:       (B, S, D)   float32
    weights: (H, S, S)
    biases:  (H, S)
    ln_gamma, ln_beta: (D//2,)
    returns: (B, S, D//2)
    """
    B, S, D = x.shape
    H = weights.shape[0]
    if D % 2 != 0:
        raise ValueError("input_dim must be even (chunk(2) + LayerNorm(D//2)).")
    dim_half = D // 2
    if dim_half % H != 0:
        raise ValueError("input_dim // 2 must be divisible by heads.")
    dh = dim_half // H

    tb = _pick_block_b(B) if block_b is None else block_b
    if B % tb != 0:
        raise ValueError("block_b must divide the batch size.")

    x = x.astype(jnp.float32)
    residual = x[..., :dim_half]
    gate = x[..., dim_half:]

    # (B, S, dim_half) -> (H, B, dh, S): S ends up on the lane axis; the head /
    # feature split only touches leading & sublane axes (cheap XLA layout work).
    def to_hbds(t):
        return jnp.transpose(t.reshape(B, S, H, dh), (2, 0, 3, 1))

    gate_r = to_hbds(gate)
    res_r = to_hbds(residual)

    w_bf16 = weights.astype(jnp.bfloat16)                   # MXU operand, halves VMEM
    bias_r = biases.reshape(H, 1, S).astype(jnp.float32)
    gamma_r = ln_gamma.reshape(H, 1, dh, 1).astype(jnp.float32)
    beta_r = ln_beta.reshape(H, 1, dh, 1).astype(jnp.float32)

    blk = (H, tb, dh, S)
    # Explicit VMEM budget: double-buffered activation blocks + weights + params.
    est = (3 * 2 * _padded_bytes(blk, jnp.float32)          # gate, residual, out
           + 2 * _padded_bytes((H, S, S), jnp.bfloat16)
           + 2 * _padded_bytes((H, 1, S), jnp.float32)
           + 4 * _padded_bytes((H, 1, dh, 1), jnp.float32)
           + (2 << 20))
    vmem_limit = int(min(max(est, 32 << 20), 127 << 20))

    out_r = pl.pallas_call(
        _gating_kernel,
        out_shape=jax.ShapeDtypeStruct((H, B, dh, S), x.dtype),
        grid_spec=pltpu.PrefetchScalarGridSpec(
            num_scalar_prefetch=0,
            grid=(B // tb,),
            in_specs=[
                pl.BlockSpec(blk, lambda b: (0, b, 0, 0)),            # gate
                pl.BlockSpec(blk, lambda b: (0, b, 0, 0)),            # residual
                pl.BlockSpec((H, S, S), lambda b: (0, 0, 0)),         # weights
                pl.BlockSpec((H, 1, S), lambda b: (0, 0, 0)),         # bias slab
                pl.BlockSpec((H, 1, dh, 1), lambda b: (0, 0, 0, 0)),  # gamma
                pl.BlockSpec((H, 1, dh, 1), lambda b: (0, 0, 0, 0)),  # beta
            ],
            out_specs=pl.BlockSpec(blk, lambda b: (0, b, 0, 0)),
        ),
        compiler_params=pltpu.CompilerParams(
            dimension_semantics=("parallel",),
            vmem_limit_bytes=vmem_limit),
    )(gate_r, res_r, w_bf16, bias_r, gamma_r, beta_r)

    # (H, B, dh, S) -> (B, S, H*dh)
    return jnp.transpose(out_r, (1, 3, 0, 2)).reshape(B, S, dim_half)


def gating_unit_reference(x, weights, biases, ln_gamma, ln_beta):
    """Pure-JAX (f32) reference mirroring the PyTorch forward."""
    B, S, D = x.shape
    H = weights.shape[0]
    dim_half = D // 2
    residual, gate = x[..., :dim_half], x[..., dim_half:]
    mean = jnp.mean(gate, axis=-1, keepdims=True)
    var = jnp.mean((gate - mean) ** 2, axis=-1, keepdims=True)
    gate = (gate - mean) / jnp.sqrt(var + LN_EPS) * ln_gamma + ln_beta
    g = gate.reshape(B, S, H, -1).transpose(0, 2, 1, 3)            # (B,H,S,dh)
    gated = jnp.einsum("hst,bhtd->bhsd", weights, g)
    gated = gated + biases[None, :, :, None]
    gated = gated.transpose(0, 2, 1, 3).reshape(B, S, -1)
    return gated * residual


if __name__ == "__main__":
    # Small shapes consistent with the module: batch=2, seq_len=8, input_dim=32, heads=2.
    B, S, D, H = 2, 8, 32, 2
    dim_half = D // 2
    init_range = 1e-3

    key = jax.random.PRNGKey(0)
    kx, kw = jax.random.split(key)

    x = jax.random.normal(kx, (B, S, D), dtype=jnp.float32)

    # Deterministic parameter init matching the module's __init__:
    #   weights ~ U(-init_range/seq_len, init_range/seq_len), biases = ones,
    #   LayerNorm gamma = ones, beta = zeros.
    weights = jax.random.uniform(
        kw, (H, S, S), dtype=jnp.float32,
        minval=-init_range / S, maxval=init_range / S)
    biases = jnp.ones((H, S), dtype=jnp.float32)
    ln_gamma = jnp.ones((dim_half,), dtype=jnp.float32)
    ln_beta = jnp.zeros((dim_half,), dtype=jnp.float32)

    out = gating_unit(x, weights, biases, ln_gamma, ln_beta)
    out = jax.block_until_ready(out)

    ref = gating_unit_reference(x, weights, biases, ln_gamma, ln_beta)
    # bf16 MXU operands (f32 accumulation) -> tolerance appropriate for bf16.
    np.testing.assert_allclose(np.asarray(out), np.asarray(ref), rtol=1e-3, atol=1e-3)

    print("KERNEL_OK")
</pallas_src>

<mosaic_0001>
module attributes {stable_mosaic.version = 11 : i64} {
  func.func @_gating_kernel(%arg0: i32, %arg1: memref<2x1x8x8xf32, #tpu.memory_space<vmem>>, %arg2: memref<2x1x8x8xf32, #tpu.memory_space<vmem>>, %arg3: memref<2x8x8xbf16, #tpu.memory_space<vmem>>, %arg4: memref<2x1x8xf32, #tpu.memory_space<vmem>>, %arg5: memref<2x1x8x1xf32, #tpu.memory_space<vmem>>, %arg6: memref<2x1x8x1xf32, #tpu.memory_space<vmem>>, %arg7: memref<2x1x8x8xf32, #tpu.memory_space<vmem>>) attributes {dimension_semantics = [#tpu.dimension_semantics<parallel>], iteration_bounds = array<i64: 2>, scalar_prefetch = 0 : i64, scratch_operands = 0 : i64, tpu.core_type = #tpu.core_type<tc>, window_params = [{transform_indices = @transform_0, window_bounds = array<i64: 2, 1, 8, 8>}, {transform_indices = @transform_1, window_bounds = array<i64: 2, 1, 8, 8>}, {pipeline_mode = #tpu.pipeline_mode<synchronous>, transform_indices = @transform_2, window_bounds = array<i64: 2, 8, 8>}, {pipeline_mode = #tpu.pipeline_mode<synchronous>, transform_indices = @transform_3, window_bounds = array<i64: 2, 1, 8>}, {pipeline_mode = #tpu.pipeline_mode<synchronous>, transform_indices = @transform_4, window_bounds = array<i64: 2, 1, 8, 1>}, {pipeline_mode = #tpu.pipeline_mode<synchronous>, transform_indices = @transform_5, window_bounds = array<i64: 2, 1, 8, 1>}, {transform_indices = @transform_6, window_bounds = array<i64: 2, 1, 8, 8>}]} {
    %c0 = arith.constant 0 : index
    %c0_0 = arith.constant 0 : index
    %c0_1 = arith.constant 0 : index
    %c0_2 = arith.constant 0 : index
    %0 = vector.load %arg1[%c0, %c0_0, %c0_1, %c0_2] : memref<2x1x8x8xf32, #tpu.memory_space<vmem>>, vector<2x1x8x8xf32>
    %cst = arith.constant dense<0.000000e+00> : vector<1x8x8xf32>
    %1 = vector.multi_reduction <add>, %0, %cst [0] : vector<2x1x8x8xf32> to vector<1x8x8xf32>
    %2 = vector.shape_cast %1 : vector<1x8x8xf32> to vector<1x1x8x8xf32>
    %cst_3 = arith.constant dense<0.000000e+00> : vector<1x1x8xf32>
    %3 = vector.multi_reduction <add>, %2, %cst_3 [2] : vector<1x1x8x8xf32> to vector<1x1x8xf32>
    %4 = vector.shape_cast %3 : vector<1x1x8xf32> to vector<1x1x1x8xf32>
    %cst_4 = arith.constant 1.600000e+01 : f32
    %5 = vector.broadcast %cst_4 : f32 to vector<1x1x1x8xf32>
    %6 = arith.divf %4, %5 : vector<1x1x1x8xf32>
    %7 = vector.broadcast %6 : vector<1x1x1x8xf32> to vector<2x1x8x8xf32>
    %8 = arith.subf %0, %7 : vector<2x1x8x8xf32>
    %9 = arith.mulf %8, %8 : vector<2x1x8x8xf32>
    %cst_5 = arith.constant dense<0.000000e+00> : vector<1x8x8xf32>
    %10 = vector.multi_reduction <add>, %9, %cst_5 [0] : vector<2x1x8x8xf32> to vector<1x8x8xf32>
    %11 = vector.shape_cast %10 : vector<1x8x8xf32> to vector<1x1x8x8xf32>
    %cst_6 = arith.constant dense<0.000000e+00> : vector<1x1x8xf32>
    %12 = vector.multi_reduction <add>, %11, %cst_6 [2] : vector<1x1x8x8xf32> to vector<1x1x8xf32>
    %13 = vector.shape_cast %12 : vector<1x1x8xf32> to vector<1x1x1x8xf32>
    %cst_7 = arith.constant 1.600000e+01 : f32
    %14 = vector.broadcast %cst_7 : f32 to vector<1x1x1x8xf32>
    %15 = arith.divf %13, %14 : vector<1x1x1x8xf32>
    %cst_8 = arith.constant 9.99999974E-6 : f32
    %16 = vector.broadcast %cst_8 : f32 to vector<1x1x1x8xf32>
    %17 = arith.addf %15, %16 : vector<1x1x1x8xf32>
    %18 = math.rsqrt %17 : vector<1x1x1x8xf32>
    %19 = vector.broadcast %18 : vector<1x1x1x8xf32> to vector<2x1x8x8xf32>
    %20 = arith.mulf %8, %19 : vector<2x1x8x8xf32>
    %c0_9 = arith.constant 0 : index
    %c0_10 = arith.constant 0 : index
    %c0_11 = arith.constant 0 : index
    %c0_12 = arith.constant 0 : index
    %21 = vector.load %arg5[%c0_9, %c0_10, %c0_11, %c0_12] : memref<2x1x8x1xf32, #tpu.memory_space<vmem>>, vector<2x1x8x1xf32>
    %22 = vector.broadcast %21 : vector<2x1x8x1xf32> to vector<2x1x8x8xf32>
    %23 = arith.mulf %20, %22 : vector<2x1x8x8xf32>
    %c0_13 = arith.constant 0 : index
    %c0_14 = arith.constant 0 : index
    %c0_15 = arith.constant 0 : index
    %c0_16 = arith.constant 0 : index
    %24 = vector.load %arg6[%c0_13, %c0_14, %c0_15, %c0_16] : memref<2x1x8x1xf32, #tpu.memory_space<vmem>>, vector<2x1x8x1xf32>
    %25 = vector.broadcast %24 : vector<2x1x8x1xf32> to vector<2x1x8x8xf32>
    %26 = arith.addf %23, %25 : vector<2x1x8x8xf32>
    %27 = vector.shape_cast %26 : vector<2x1x8x8xf32> to vector<2x8x8xf32>
    %28 = arith.truncf %27 : vector<2x8x8xf32> to vector<2x8x8xbf16>
    %c0_17 = arith.constant 0 : index
    %c0_18 = arith.constant 0 : index
    %c0_19 = arith.constant 0 : index
    %29 = vector.load %arg3[%c0_17, %c0_18, %c0_19] : memref<2x8x8xbf16, #tpu.memory_space<vmem>>, vector<2x8x8xbf16>
    %cst_20 = arith.constant dense<0.000000e+00> : vector<2x8x8xf32>
    %30 = tpu.matmul %28, %29, %cst_20 {dimension_numbers = #tpu.dot_dimension_numbers<[2], [2], [1], [1], [0, 0, 0, 1, 1, 1], [0], [0]>} : vector<2x8x8xbf16>, vector<2x8x8xbf16>, vector<2x8x8xf32> -> vector<2x8x8xf32>
    %c0_21 = arith.constant 0 : index
    %c0_22 = arith.constant 0 : index
    %c0_23 = arith.constant 0 : index
    %31 = vector.load %arg4[%c0_21, %c0_22, %c0_23] : memref<2x1x8xf32, #tpu.memory_space<vmem>>, vector<2x1x8xf32>
    %32 = vector.broadcast %31 : vector<2x1x8xf32> to vector<2x8x8xf32>
    %33 = arith.addf %30, %32 : vector<2x8x8xf32>
    %34 = vector.shape_cast %33 : vector<2x8x8xf32> to vector<2x1x8x8xf32>
    %c0_24 = arith.constant 0 : index
    %c0_25 = arith.constant 0 : index
    %c0_26 = arith.constant 0 : index
    %c0_27 = arith.constant 0 : index
    %35 = vector.load %arg2[%c0_24, %c0_25, %c0_26, %c0_27] : memref<2x1x8x8xf32, #tpu.memory_space<vmem>>, vector<2x1x8x8xf32>
    %36 = arith.mulf %34, %35 : vector<2x1x8x8xf32>
    %c0_28 = arith.constant 0 : index
    %c0_29 = arith.constant 0 : index
    %c0_30 = arith.constant 0 : index
    %c0_31 = arith.constant 0 : index
    %37 = vector.load %arg7[%c0_28, %c0_29, %c0_30, %c0_31] : memref<2x1x8x8xf32, #tpu.memory_space<vmem>>, vector<2x1x8x8xf32>
    tpu.vector_store %arg7[%c0_28, %c0_29, %c0_30, %c0_31], %36 {strides = array<i32>} : memref<2x1x8x8xf32, #tpu.memory_space<vmem>>, vector<2x1x8x8xf32>,
    return
  }
  func.func @transform_0(%arg0: i32) -> (i32, i32, i32, i32) {
    %c0_i32 = arith.constant 0 : i32
    %c0_i32_0 = arith.constant 0 : i32
    %c0_i32_1 = arith.constant 0 : i32
    %c0_i32_2 = arith.constant 0 : i32
    return %c0_i32, %arg0, %c0_i32_0, %c0_i32_1 : i32, i32, i32, i32
  }
  func.func @transform_1(%arg0: i32) -> (i32, i32, i32, i32) {
    %c0_i32 = arith.constant 0 : i32
    %c0_i32_0 = arith.constant 0 : i32
    %c0_i32_1 = arith.constant 0 : i32
    %c0_i32_2 = arith.constant 0 : i32
    return %c0_i32, %arg0, %c0_i32_0, %c0_i32_1 : i32, i32, i32, i32
  }
  func.func @transform_2(%arg0: i32) -> (i32, i32, i32) {
    %c0_i32 = arith.constant 0 : i32
    %c0_i32_0 = arith.constant 0 : i32
    %c0_i32_1 = arith.constant 0 : i32
    %c0_i32_2 = arith.constant 0 : i32
    return %c0_i32, %c0_i32_0, %c0_i32_1 : i32, i32, i32
  }
  func.func @transform_3(%arg0: i32) -> (i32, i32, i32) {
    %c0_i32 = arith.constant 0 : i32
    %c0_i32_0 = arith.constant 0 : i32
    %c0_i32_1 = arith.constant 0 : i32
    %c0_i32_2 = arith.constant 0 : i32
    return %c0_i32, %c0_i32_0, %c0_i32_1 : i32, i32, i32
  }
  func.func @transform_4(%arg0: i32) -> (i32, i32, i32, i32) {
    %c0_i32 = arith.constant 0 : i32
    %c0_i32_0 = arith.constant 0 : i32
    %c0_i32_1 = arith.constant 0 : i32
    %c0_i32_2 = arith.constant 0 : i32
    %c0_i32_3 = arith.constant 0 : i32
    return %c0_i32, %c0_i32_0, %c0_i32_1, %c0_i32_2 : i32, i32, i32, i32
  }
  func.func @transform_5(%arg0: i32) -> (i32, i32, i32, i32) {
    %c0_i32 = arith.constant 0 : i32
    %c0_i32_0 = arith.constant 0 : i32
    %c0_i32_1 = arith.constant 0 : i32
    %c0_i32_2 = arith.constant 0 : i32
    %c0_i32_3 = arith.constant 0 : i32
    return %c0_i32, %c0_i32_0, %c0_i32_1, %c0_i32_2 : i32, i32, i32, i32
  }
  func.func @transform_6(%arg0: i32) -> (i32, i32, i32, i32) {
    %c0_i32 = arith.constant 0 : i32
    %c0_i32_0 = arith.constant 0 : i32
    %c0_i32_1 = arith.constant 0 : i32
    %c0_i32_2 = arith.constant 0 : i32
    return %c0_i32, %arg0, %c0_i32_0, %c0_i32_1 : i32, i32, i32, i32
  }
}

</mosaic_0001>

<bundles_post_ra>
// kernel: tpu_custom_call.1
= control target key start
LH: loop header
LB: loop body
LE: loop exit
PB: predicated region body
PF: predicated region fallthrough
CT: control target
= control target key end

     0   :  { %11 = vsyncpa [#allocation4], 0  ;;  %s1046_s0 = inlined_call_operand.vmem [shape: f32[2,2,8,8], index: 0, kind: input, shape index: {}]   ;;  %s1047_s1 = inlined_call_operand.hbm [shape: f32[2,2,8,8], index: 1, kind: input, shape index: {}]   ;;  %s1048_s2 = inlined_call_operand.vmem [shape: bf16[2,8,8], index: 2, kind: input, shape index: {}]   ;;  %s1049_s3 = inlined_call_operand.vmem [shape: f32[2,1,8], index: 3, kind: input, shape index: {}]   ;;  %s1050_s4 = inlined_call_operand.vmem [shape: f32[2,1,8,1], index: 4, kind: input, shape index: {}]   ;;  %s1051_s5 = inlined_call_operand.vmem [shape: f32[2,1,8,1], index: 5, kind: input, shape index: {}]   ;;  %s1052_s6 = inlined_call_operand.hbm [shape: f32[2,2,8,8], index: 6, kind: output, shape index: {}]  }
   0x1   :  { %13 = vsyncpa [#allocation4 + $0x1], 0 }
   0x2   :  { %14 = vsyncpa [#allocation5], 0 }
   0x3   :  { %16 = vsyncpa [#allocation5 + $0x1], 0  ;;  %s841_s21 = smov 0   ;;  %s843_s22 = smov 0  }
   0x4   :  { %s845_s23 = smov 0   ;;  %s847_s24 = smov 0  }
   0x5 LB: > { %s862_s25 = sadd.s32 4294967295, %s793_s24   ;;  %s610_s26 = sadd.s32 4294967294, %s793_s24   ;;  %s793_s24 = sphi %s847_s24, %s1065_s24   ;;  %s789_s23 = sphi %s845_s23, %s1064_s23   ;;  %s785_s22 = sphi %s843_s22, %s1063_s22   ;;  %s781_s21 = sphi %s841_s21, %s1062_s21  }
   0x6   : > { %s866_s27 = sadd.s32 1, %s793_s24   ;;  %s29_s28 = sadd.s32 1, %s789_s23 }
   0x7   : > { %s26_s29 = ssub.s32 %s793_s24, %s866_s27  ;;  %p36_p0 = scmp.ne.s32.totalorder %s789_s23, %s785_s22 }
   0x8   : > { %p27_p1 = scmp.eq.s32.totalorder %s26_s29, 0  ;;  %p37_p2 = scmp.eq.s32.totalorder %s793_s24, 0 }
   0x9   : > { %p68_p3 = scmp.ne.s32.totalorder %s785_s22, %s781_s21  ;;  %p69_p4 = scmp.eq.s32.totalorder %s862_s25, 0 }
   0xa   : > { %s878_s30 = scalar_select %p27_p1, %s789_s23, %s29_s28  }
   0xb   : > { %p880_p5 = por %p37_p2, %p36_p0  ;;  %p884_p6 = por %p69_p4, %p68_p3 }
   0xc   : > { %p176_p7 = scmp.eq.s32.totalorder %s862_s25, 1  ;;  %p182_p8 = scmp.eq.s32.totalorder %s610_s26, 1 }
   0xd   : > { %p1053_p11 = scmp.ge.s32.totalorder %s793_s24, 2 }
   0xe   : > { %p889_p9 = por %p176_p7, %p36_p0  ;;  %p893_p10 = por %p182_p8, %p68_p3 }
   0xf   : > { %210 = sbr.rel (%p1053_p11) target bundleno = 56 (0x38), region = 32 }
  0x10   : > { %s1057_s9 = scalar_select %p889_p9, 1, 0 }
  0x11   : > { %s1058_s10 = scalar_select %p893_p10, 1, 0 }
  0x16   : > { %213 = sbr.rel (!%p880_p5) target bundleno = 29 (0x1d), region = 36  ;;  %s215_s11 = sand.u32 (%p880_p5), 1, %s789_s23  }
  0x17   : > { %s614_s12 = sshll.u32 (%p880_p5), %s793_s24, 3  ;;  %s613_s13 = sshll.u32 (%p880_p5), %s215_s11, 4 }
  0x18   : > { %s219_s16 = scalar_lea.vmem (%p880_p5), %s1046_s0, %s614_s12  ;;  %s217_s17 = scalar_lea.vmem (%p880_p5), [#allocation2], %s613_s13 }
  0x19   : > { %v249_v0 = vld [vmem:[%s219_s16] sm:$0xff] (%p880_p5)  ;;  %v251_v1 = vld [vmem:[%s219_s16 + $0x10] sm:$0xff] (%p880_p5) }
  0x1a   : > { %250 = vst [vmem:[%s217_s17] sm:$0xff] (%p880_p5), %v249_v0  ;;  %252 = vst [vmem:[%s217_s17 + $0x8] sm:$0xff] (%p880_p5), %v251_v1 }
  0x1d PF: > { %s259_s18 = sand.u32 1, %s789_s23   ;;  %s616_s19 = sshll.u32 %s793_s24, 7 }
  0x1e   : > { %s615_s20 = sshll.u32 %s259_s18, 4  ;;  %s912_s29 = scalar_lea.hbm %s1047_s1, %s616_s19 }
  0x1f   : > { %s263_s11 = scalar_lea.vmem [#allocation3], %s615_s20  ;;  %s916_s13 = scalar_lea.sflag [#allocation4], %s259_s18 }
  0x20   : > { %s269_s12 = sshll.u32 %s263_s11, 4  ;;  %s699_s14 = scalar_lea.hbm %s912_s29, 256  ;;  %s914_s12 = int_to_ptr.vmem [resolvable:$true] %s269_s12 }
  0x21   : > { %p700_p12 = scmp.ne.s32.totalorder %s912_s29, %s699_s14  ;;  %s703_s17 = scalar_lea.hbm %s1047_s1, 512 }
  0x22   : > { %p704_p1 = scmp.lt.u32.totalorder %s912_s29, %s1047_s1  ;;  %p705_p2 = scmp.lt.u32.totalorder %s703_s17, %s699_s14 }
  0x23   : > { %p701_p13 = pnand %p700_p12, %p880_p5  ;;  %p707_p4 = scmp.lt.u32.totalorder %s699_s14, %s912_s29 }
  0x24   : > { %p706_p3 = por %p705_p2, %p704_p1 }
  0x25   : > { %p702_p0 = pneg %p701_p13 }
  0x26   : > { %p708_p7 = por %p707_p4, %p706_p3 }
  0x28   : > { %p709_p8 = pnand %p708_p7, %p702_p0 }
  0x2a   : > { %712 = shalt.err (!%p709_p8)
}
  0x2b   : > { %s713_s18 = scalar_lea.vmem %s914_s12, 256  ;;  %s795_s20 = smov [#allocation3]  }
  0x2c   : > { %p714_p12 = scmp.ne.s32.totalorder %s914_s12, %s713_s18  ;;  %s717_s28 = sshll.u32 %s795_s20, 4  ;;  %s718_s28 = int_to_ptr.vmem [resolvable:$false] %s717_s28 }
  0x2d   : > { %s719_s11 = scalar_lea.vmem %s718_s28, 512  ;;  %p720_p10 = scmp.lt.s32.totalorder %s914_s12, %s718_s28 }
  0x2e   : > { %p715_p13 = pnand %p714_p12, %p880_p5  ;;  %p721_p9 = scmp.lt.s32.totalorder %s719_s11, %s713_s18 }
  0x30   : > { %p716_p11 = pneg %p715_p13  ;;  %p722_p1 = por %p721_p9, %p720_p10 }
  0x32   : > { %p723_p2 = pnand %p722_p1, %p716_p11 }
  0x34   : > { %726 = shalt.err (!%p723_p2)
}
  0x35   : > { %s796_s14 = smov 256   ;;  %s797_s15 = smov 128  }
  0x36   : > { %s798_s16 = smov 8  }
  0x37   : > { %645 = dma.hbm_to_vmem [thread:$0]  (%p880_p5), %s912_s29, 256, %s914_s12, %s916_s13, %s796_s14, %s797_s15, %s798_s16  }
  0x38 PF: > { %p617_p0 = scmp.ge.s32.totalorder %s793_s24, 1  ;;  %p277_p3 = scmp.lt.s32.totalorder %s793_s24, 3 }
  0x3a   : > { %p278_p4 = pnand %p617_p0, %p277_p3 }
  0x3b   : > { %s943_s17 = sand.u32 (!%p278_p4), 1, %s785_s22  }
  0x3c   : > { %281 = sbr.rel (%p278_p4) target bundleno = 441 (0x1b9), region = 78  ;;  %s946_s19 = sshll.u32 (!%p278_p4), %s943_s17, 4 }
  0x3d   : > { %s286_s26 = scalar_lea.vmem (!%p278_p4), [#allocation2], %s946_s19  ;;  %s291_s7 = scalar_lea.sflag (!%p278_p4), [#allocation4], %s943_s17 }
  0x3e   : > { %s294_s29 = scalar_lea.vmem (!%p278_p4), [#allocation3], %s946_s19 }
  0x43   : > { %772 = dma.done.wait (%p884_p6), %s291_s7, 256  }
  0x44   : > { %774 = vsyncadd (%p884_p6), %s291_s7, 4294967040  ;;  %v799_v2 = vmov 0   ;;  %v800_v3 = vmov 0.0   ;;  %v376_v4 = vld [vmem:[%s1051_s5] sm:$0xff]  ;;  %vm330_vm0 = vcmask 64512   ;;  %v377_v7 = vld [vmem:[%s1051_s5 + $0x8] sm:$0xff] }
  0x45   : > { %696 = vset.pattern.permute.xlu1 %v799_v2  ;;  %695 = vset.pattern.permute.xlu0 %v799_v2  ;;  %v362_v5 = vld [vmem:[%s1050_s4] sm:$0xff]  ;;  %v363_v8 = vld [vmem:[%s1050_s4 + $0x8] sm:$0xff]  ;;  %vm801_vm1 = vmmov 0   ;;  %s326_s18 = scalar_lea.vmem [#allocation6], %s946_s19  ;;  %s626_s11 = sshll.u32 %s862_s25, 7 }
  0x46   : > { %633 = vmatprep.subr.bf16.mxu0 %v800_v3  ;;  %639 = vmatprep.subr.bf16.mxu1 %v800_v3  ;;  %v392_v6 = vld [vmem:[%s1048_s2] sm:$0xf]  ;;  %v393_v10 = vld [vmem:[%s1048_s2 + $0x4] sm:$0xf]  ;;  %v329_v13 = vld [vmem:[%s286_s26 + $0x8] sm:$0xff]  ;;  %s519_s20 = sshll.u32 %s326_s18, 4  ;;  %s1001_s16 = scalar_lea.hbm %s1052_s6, %s626_s11  ;;  %s996_s20 = int_to_ptr.vmem [resolvable:$true] %s519_s20 }
  0x47   : > { %380 = vperm.xlu1 %696, %v376_v4   ;;  %366 = vperm.xlu0 %695, %v362_v5   ;;  %v412_v9 = vsel %vm330_vm0, %v392_v6, 0  ;;  %v458_v11 = vsel %vm330_vm0, %v393_v10, 0  ;;  %v328_v12 = vld [vmem:[%s286_s26] sm:$0xff]  ;;  %v332_v15 = vsel %vm330_vm0, %v329_v13, 0.0  ;;  %v501_v0 = vld [vmem:[%s294_s29 + $0x8] sm:$0xff]  ;;  %s507_s25 = scalar_lea.sflag [#allocation5], %s943_s17 }
  0x48   : > { %634 = vmatpush3.bf16.xpose.msra.mxu0 %v412_v9  ;;  %640 = vmatpush3.bf16.xpose.msra.mxu1 %v458_v11  ;;  %v331_v14 = vsel %vm330_vm0, %v328_v12, 0.0  ;;  %v621_v54 = vld [vmem:[%s1049_s3] ss:$0 sm:$0xff]  ;;  %v622_v60 = vld [vmem:[%s1049_s3 + $0x1] ss:$0 sm:$0xff]  ;;  %s727_s19 = scalar_lea.vmem %s996_s20, 256 }
  0x49   : > { %635 = vmatprep.mubr.msk.bf16.mxu0 %vm801_vm1, %v800_v3  ;;  %641 = vmatprep.mubr.msk.bf16.mxu1 %vm801_vm1, %v800_v3  ;;  %v333_v16 = vadd.f32 %v332_v15, %v331_v14  ;;  %v500_v56 = vld [vmem:[%s294_s29] sm:$0xff]  ;;  %p728_p5 = scmp.ne.s32.totalorder %s996_s20, %s727_s19  ;;  %p1059_p6 = scmp.ne.s32.totalorder %s1057_s9, 0 }
  0x4a   : > { %s802_s29 = smov [#allocation6]  }
  0x4b   : > { %385 = vperm.xlu1 %696, %v377_v7   ;;  %371 = vperm.xlu0 %695, %v363_v8   ;;  %v334_v17 = vsel %vm330_vm0, %v333_v16, 0.0  ;;  %p729_p9 = pnand %p728_p5, %p1059_p6  ;;  %s731_s7 = sshll.u32 %s802_s29, 4  ;;  %s732_s7 = int_to_ptr.vmem [resolvable:$false] %s731_s7 }
  0x4c   : > { %v335_v18 = vrot.slane %v334_v17, 4  ;;  %s733_s12 = scalar_lea.vmem %s732_s7, 512  ;;  %p734_p11 = scmp.lt.s32.totalorder %s996_s20, %s732_s7 }
  0x4d   : > { %p730_p10 = pneg %p729_p9  ;;  %p735_p7 = scmp.lt.s32.totalorder %s733_s12, %s727_s19 }
  0x4e   : > { %v336_v19 = vadd.f32 %v335_v18, %v334_v17 }
  0x4f   : > { %p736_p8 = por %p735_p7, %p734_p11 }
  0x50   : > { %v337_v20 = vrot.slane %v336_v19, 2 }
  0x51   : > { %p737_p12 = pnand %p736_p8, %p730_p10 }
  0x52   : > { %v338_v21 = vadd.f32 %v337_v20, %v336_v19 }
  0x54   : > { %v339_v22 = vrot.slane %v338_v21, 1 }
  0x56   : > { %v340_v23 = vadd.f32 %v339_v22, %v338_v21 }
  0x58   : > { %v342_v24 = vmul.f32 0.0625, %v340_v23 }
  0x5a   : > { %v343_v25 = vsub.f32 %v328_v12, %v342_v24  ;;  %v344_v26 = vsub.f32 %v329_v13, %v342_v24 }
  0x5c   : > { %v345_v27 = vmul.f32 %v343_v25, %v343_v25  ;;  %v346_v28 = vmul.f32 %v344_v26, %v344_v26 }
  0x5e   : > { %v347_v29 = vsel %vm330_vm0, %v345_v27, 0.0  ;;  %v348_v30 = vsel %vm330_vm0, %v346_v28, 0.0 }
  0x5f   : > { %v349_v31 = vadd.f32 %v348_v30, %v347_v29 }
  0x61   : > { %v350_v32 = vsel %vm330_vm0, %v349_v31, 0.0 }
  0x62   : > { %v351_v33 = vrot.slane %v350_v32, 4 }
  0x64   : > { %v352_v34 = vadd.f32 %v351_v33, %v350_v32 }
  0x66   : > { %v353_v35 = vrot.slane %v352_v34, 2 }
  0x68   : > { %v354_v36 = vadd.f32 %v353_v35, %v352_v34 }
  0x6a   : > { %v355_v37 = vrot.slane %v354_v36, 1 }
  0x6c   : > { %v356_v38 = vadd.f32 %v355_v37, %v354_v36 }
  0x6e   : > { %v357_v39 = vmul.f32 0.0625, %v356_v38 }
  0x70   : > { %v358_v40 = vadd.f32 1e-05, %v357_v39 }
  0x72   : > { %697 = vrsqrt.f32 %v358_v40 }
  0x7c   : > { %v698_v41 = vpop.eup %697 }
  0x7d   : > { %v360_v42 = vmul.f32 %v698_v41, %v343_v25  ;;  %v361_v46 = vmul.f32 %v698_v41, %v344_v26 }
  0xc6   : > { %v381_v43 = vpop.permute.xlu1 %380  ;;  %v367_v44 = vpop.permute.xlu0 %366 }
  0xc7   : > { %v374_v45 = vmul.f32 %v367_v44, %v360_v42 }
  0xc9   : > { %v388_v47 = vadd.f32 %v381_v43, %v374_v45 }
  0xca   : > { %v372_v48 = vpop.permute.xlu0 %371  ;;  %v386_v51 = vpop.permute.xlu1 %385 }
  0xcb   : > { %v390_v49 = vpack.c.bf16 %v388_v47, %v388_v47  ;;  %v375_v50 = vmul.f32 %v372_v48, %v361_v46 }
  0xcd   : > { %v389_v52 = vadd.f32 %v386_v51, %v375_v50  ;;  %636 = vmatmul.mubr.msk.bf16.vlgmr.msra.gmra.mrb[0].mxu0 %vm330_vm0, %v390_v49 }
  0xcf   : > { %v391_v53 = vpack.c.bf16 %v389_v52, %v389_v52 }
  0xd1   : > { %642 = vmatmul.mubr.msk.bf16.vlgmr.msra.gmra.mrb[0].mxu1 %vm330_vm0, %v391_v53 }
 0x1a0   : > { %v448_v55 = vpop.f32.mrb[0].mxu0 }
 0x1a1   : > { %v449_v57 = vadd.f32 %v621_v54, %v448_v55  ;;  %v637_v58 = vpop.f32.mrb[1].mxu0 }
 0x1a2   : > { %v451_v59 = vpop.f32.mrb[2].mxu0 }
 0x1a3   : > { %v502_v61 = vmul.f32 %v500_v56, %v449_v57  ;;  %v638_v62 = vpop.f32.mrb[3].mxu0 }
 0x1a4   : > { %v494_v63 = vpop.f32.mrb[0].mxu1 }
 0x1a5   : > { %504 = vst.msk [vmem:[%s326_s18] sm:$0xff] %vm330_vm0, %v502_v61  ;;  %v495_v1 = vadd.f32 %v622_v60, %v494_v63  ;;  %v643_v2 = vpop.f32.mrb[1].mxu1 }
 0x1a6   : > { %v497_v3 = vpop.f32.mrb[2].mxu1 }
 0x1a7   : > { %v503_v4 = vmul.f32 %v501_v0, %v495_v1  ;;  %v644_v5 = vpop.f32.mrb[3].mxu1 }
 0x1a9   : > { %505 = vst.msk [vmem:[%s326_s18 + $0x8] sm:$0xff] %vm330_vm0, %v503_v4 }
 0x1aa   : > { %740 = shalt.err (!%p737_p12)
}
 0x1ab   : > { %s741_s26 = scalar_lea.hbm %s1001_s16, 256  ;;  %s745_s28 = scalar_lea.hbm %s1052_s6, 512 }
 0x1ac   : > { %p742_p13 = scmp.ne.s32.totalorder %s1001_s16, %s741_s26  ;;  %p746_p0 = scmp.lt.u32.totalorder %s1001_s16, %s1052_s6 }
 0x1ad   : > { %p747_p3 = scmp.lt.u32.totalorder %s745_s28, %s741_s26  ;;  %p749_p5 = scmp.lt.u32.totalorder %s741_s26, %s1001_s16 }
 0x1ae   : > { %p743_p1 = pnand %p742_p13, %p1059_p6 }
 0x1af   : > { %p748_p4 = por %p747_p3, %p746_p0 }
 0x1b0   : > { %p744_p2 = pneg %p743_p1 }
 0x1b1   : > { %p750_p9 = por %p749_p5, %p748_p4 }
 0x1b3   : > { %p751_p10 = pnand %p750_p9, %p744_p2 }
 0x1b5   : > { %754 = shalt.err (!%p751_p10)
}
 0x1b6   : > { %s803_s14 = smov 128   ;;  %s804_s15 = smov 256  }
 0x1b7   : > { %s805_s19 = smov 8  }
 0x1b8   : > { %647 = dma.vmem_to_hbm [thread:$0]  (%p1059_p6), %s996_s20, 256, %s1001_s16, %s507_s25, %s803_s14, %s804_s15, %s805_s19  }
 0x1b9 PF: > { %s534_s29 = sand.u32 1, %s781_s21   ;;  %p1060_p11 = scmp.ne.s32.totalorder %s1058_s10, 0 }
 0x1ba   : > { %p1061_p7 = scmp.ge.s32.totalorder %s793_s24, 2  ;;  %s535_s7 = scalar_lea.sflag [#allocation5], %s534_s29 }
 0x1bc   : > { %p650_p8 = pnand %p1061_p7, %p1060_p11 }
 0x1be   : > { %776 = dma.done.wait (!%p650_p8), %s535_s7, 256  }
 0x1bf   : > { %778 = vsyncadd (!%p650_p8), %s535_s7, 4294967040  ;;  %p19_p12 = scmp.ge.s32.totalorder %s866_s27, 4   ;;  %s1062_s21 = smov %s785_s22 }
 0x1c0   : > { %s1063_s22 = smov %s789_s23  ;;  %s1064_s23 = smov %s878_s30 }
 0x1c1   : > { %s1065_s24 = smov %s866_s27  ;;  %21 = sbr.rel (!%p19_p12) target bundleno = 5 (0x5), region = 135 }
 0x1c8   :  { %540 = vsyncpa [#allocation4], 1 }
 0x1c9   :  { %542 = vsyncpa [#allocation4 + $0x1], 1 }
 0x1ca   :  { %543 = vsyncpa [#allocation5], 1 }
 0x1cb   :  { %545 = vsyncpa [#allocation5 + $0x1], 1 }

</bundles_post_ra>
